<compile_context>
chip_gen: v7x
topology: tpu7x:2x2x1
jax: 0.10.0
libtpu: 0.0.40
codegen_flags: <defaults>
</compile_context>

<pallas_src>
import functools

import jax
import jax.numpy as jnp
import numpy as np
from jax.experimental import pallas as pl
from jax.experimental.pallas import tpu as pltpu


def _dice_stats_kernel(pred_ref, target_ref, out_ref,
                       pt_acc, pe_acc, te_acc, *,
                       num_classes, ignore_index, exponent,
                       valid_len, tile_m, ragged, last_tile_offset):
    s = pl.program_id(1)
    i = pl.program_id(2)

    @pl.when(i == 0)
    def _():
        pt_acc[...] = jnp.zeros_like(pt_acc)
        pe_acc[...] = jnp.zeros_like(pe_acc)
        te_acc[...] = jnp.zeros_like(te_acc)

    n_folds = tile_m // 128

    def _fold(term):
        # Pairwise tree of lane-aligned (C, 128) slice adds: same VALU add
        # count as accumulating every vreg, but only one (C, 128) accumulator
        # load/store per tile and log-depth dependency chain.
        parts = [term[:, j * 128:(j + 1) * 128] for j in range(n_folds)]
        while len(parts) > 1:
            nxt = [a + b for a, b in zip(parts[0::2], parts[1::2])]
            if len(parts) % 2:
                nxt.append(parts[-1])
            parts = nxt
        return parts[0]

    def _accumulate(mask_ragged):
        p = pred_ref[0].astype(jnp.float32)                       # (C, TM)
        t = target_ref[0]                                         # (1, TM)
        if mask_ragged:
            # Only the last global tile can be ragged; its offset is static.
            lane_idx = (jax.lax.broadcasted_iota(jnp.int32, (1, tile_m), 1)
                        + last_tile_offset)
            lane_ok = lane_idx < valid_len                        # (1, TM)
            # Zero garbage lanes before exp so softmax stays finite.
            p = jnp.where(lane_ok, p, 0.0)
            valid = jnp.logical_and(lane_ok, t != ignore_index)
        else:
            valid = t != ignore_index
        valid_f = valid.astype(jnp.float32)                       # (1, TM)

        # Softmax over the class (sublane) axis -- XLU reduce, no MXU.
        m = jnp.max(p, axis=0, keepdims=True)                     # (1, TM)
        e = jnp.exp(p - m)                                        # (C, TM)
        denom = jnp.sum(e, axis=0, keepdims=True)                 # (1, TM)
        sm = e * pl.reciprocal(denom, approx=False)               # (C, TM)
        sm_v = sm * valid_f                                       # (C, TM)

        tc = jnp.clip(t, 0, num_classes - 1)                      # (1, TM)
        cls = jax.lax.broadcasted_iota(jnp.int32, (num_classes, tile_m), 0)
        sel = cls == tc                                           # (C, TM)

        if exponent == 2:
            pe = sm_v * sm                 # one valid factor suffices (0/1)
        elif isinstance(exponent, int):
            pe = jax.lax.integer_pow(sm, exponent) * valid_f
        else:
            pe = (sm ** exponent) * valid_f

        pt_acc[...] += _fold(jnp.where(sel, sm_v, 0.0))
        pe_acc[...] += _fold(pe)
        # onehot ** exponent == onehot for 0/1 labels.
        te_acc[...] += _fold(jnp.where(sel, valid_f, 0.0))

    if ragged:
        is_last_global = jnp.logical_and(s == pl.num_programs(1) - 1,
                                         i == pl.num_programs(2) - 1)

        @pl.when(is_last_global)
        def _():
            _accumulate(True)

        @pl.when(jnp.logical_not(is_last_global))
        def _():
            _accumulate(False)
    else:
        _accumulate(False)

    @pl.when(i == pl.num_programs(2) - 1)
    def _():
        out_ref[0, 0] = jnp.concatenate(
            [jnp.sum(pt_acc[...], axis=1, keepdims=True),
             jnp.sum(pe_acc[...], axis=1, keepdims=True),
             jnp.sum(te_acc[...], axis=1, keepdims=True)],
            axis=1)                                               # (C, 3)


def dice_loss(pred, target, *, smooth=1.0, exponent=2, loss_weight=1.0,
              ignore_index=-1, tile_m=None):
    """Pallas implementation of DiceLoss.forward.

    pred:   (B, C, *spatial) float (class dim = axis 1; f32 or bf16)
    target: (B, *spatial)    int   (labels; elements == ignore_index dropped)
    """
    num_classes = pred.shape[1]
    batch = pred.shape[0]

    # Free reshapes only -- no transpose / pad HBM passes before the kernel.
    pred3 = pred.reshape(batch, num_classes, -1)           # (B, C, M)
    m_total = pred3.shape[2]
    target3 = target.reshape(batch, 1, m_total).astype(jnp.int32)

    # ---- Lane tile: ~1 MiB of pred per grid step (amortize step overhead). ----
    if tile_m is None:
        per_lane_bytes = num_classes * pred3.dtype.itemsize
        tm = -(-(1 << 20) // per_lane_bytes)
        tm = max(2048, min(((tm + 127) // 128) * 128, 16384))
    else:
        tm = int(tile_m)
    tm = max(128, min(tm, -(-m_total // 128) * 128))       # single block if tiny
    tm = (tm // 128) * 128
    grid_m_total = -(-m_total // tm)
    ragged = (m_total % tm) != 0

    # ---- Split the M-tile axis into an extra parallel grid axis so both v7x
    #      TensorCores get work at small batch (no data movement, just index_map).
    split = 1
    if batch < 4 and grid_m_total > 1:
        needed = -(-4 // batch)
        for s in (needed, 4, 2):
            if s > 1 and grid_m_total % s == 0:
                split = s
                break
    grid_m_inner = grid_m_total // split

    kernel = functools.partial(
        _dice_stats_kernel,
        num_classes=num_classes,
        ignore_index=ignore_index,
        exponent=exponent,
        valid_len=m_total,
        tile_m=tm,
        ragged=ragged,
        last_tile_offset=(grid_m_total - 1) * tm,
    )

    stats = pl.pallas_call(
        kernel,
        out_shape=jax.ShapeDtypeStruct((batch, split, num_classes, 3),
                                       jnp.float32),
        grid_spec=pltpu.PrefetchScalarGridSpec(
            num_scalar_prefetch=0,
            grid=(batch, split, grid_m_inner),
            in_specs=[
                pl.BlockSpec((1, num_classes, tm),
                             lambda b, s, i: (b, 0, s * grid_m_inner + i)),
                pl.BlockSpec((1, 1, tm),
                             lambda b, s, i: (b, 0, s * grid_m_inner + i)),
            ],
            out_specs=pl.BlockSpec((1, 1, num_classes, 3),
                                   lambda b, s, i: (b, s, 0, 0)),
            scratch_shapes=[
                pltpu.VMEM((num_classes, 128), jnp.float32),
                pltpu.VMEM((num_classes, 128), jnp.float32),
                pltpu.VMEM((num_classes, 128), jnp.float32),
            ],
        ),
        compiler_params=pltpu.CompilerParams(
            dimension_semantics=("parallel", "parallel", "arbitrary")),
    )(pred3, target3)

    totals = jnp.sum(stats, axis=(0, 1))                   # (C, 3)
    pt, pe, te = totals[:, 0], totals[:, 1], totals[:, 2]
    num = 2.0 * pt + smooth
    den = pe + te + smooth
    dice = 1.0 - num / den
    # The PyTorch loop skips class i == ignore_index (no-op for default -1).
    class_ids = jnp.arange(num_classes)
    dice = jnp.where(class_ids == ignore_index, 0.0, dice)
    return loss_weight * jnp.sum(dice) / num_classes


def _dice_loss_ref(pred, target, *, smooth=1.0, exponent=2, loss_weight=1.0,
                   ignore_index=-1):
    """Pure-JAX reference mirroring the PyTorch forward (for verification)."""
    num_classes = pred.shape[1]
    p2 = jnp.moveaxis(pred, 1, 0).reshape(num_classes, -1).T.astype(jnp.float32)
    t1 = target.reshape(-1).astype(jnp.int32)
    valid = (t1 != ignore_index).astype(jnp.float32)
    sm = jax.nn.softmax(p2, axis=1)
    onehot = jax.nn.one_hot(jnp.clip(t1, 0, num_classes - 1), num_classes)
    total = 0.0
    for i in range(num_classes):
        if i != ignore_index:
            num = jnp.sum(sm[:, i] * onehot[:, i] * valid) * 2 + smooth
            den = jnp.sum((sm[:, i] ** exponent + onehot[:, i] ** exponent)
                          * valid) + smooth
            total += 1.0 - num / den
    return loss_weight * total / num_classes


if __name__ == "__main__":
    key = jax.random.PRNGKey(0)
    k1, k2, k3, k4, k5, k6 = jax.random.split(key, 6)

    # Case 1: small NCHW input, single M-tile (adaptive tm -> one 256-lane block,
    # exercises the in-register lane fold with n_folds=2).
    B, C, H, W = 2, 4, 16, 16
    pred = jax.random.normal(k1, (B, C, H, W), dtype=jnp.float32)
    target = jax.random.randint(k2, (B, H, W), -1, C, dtype=jnp.int32)  # incl. -1
    loss = jax.block_until_ready(dice_loss(pred, target))
    ref = jax.block_until_ready(_dice_loss_ref(pred, target))
    assert np.allclose(np.asarray(loss), np.asarray(ref), rtol=1e-3, atol=1e-3), \
        (loss, ref)

    # Case 2: ragged point count + multi-tile grid + M-split parallel axis.
    B2, C2, H2, W2 = 2, 5, 16, 13          # M = 208 -> 2 tiles of 128, last ragged
    pred2 = jax.random.normal(k3, (B2, C2, H2, W2), dtype=jnp.float32)
    target2 = jax.random.randint(k4, (B2, H2, W2), -1, C2, dtype=jnp.int32)
    loss2 = jax.block_until_ready(dice_loss(pred2, target2, tile_m=128))
    ref2 = jax.block_until_ready(_dice_loss_ref(pred2, target2))
    assert np.allclose(np.asarray(loss2), np.asarray(ref2), rtol=1e-3, atol=1e-3), \
        (loss2, ref2)

    # Case 3: batch=1 (M split across the parallel axis), bf16 pred fed directly.
    B3, C3, H3, W3 = 1, 6, 16, 32          # M = 512 -> 4 tiles of 128, split=4
    pred3 = jax.random.normal(k5, (B3, C3, H3, W3),
                              dtype=jnp.float32).astype(jnp.bfloat16)
    target3 = jax.random.randint(k6, (B3, H3, W3), -1, C3, dtype=jnp.int32)
    loss3 = jax.block_until_ready(dice_loss(pred3, target3, tile_m=128))
    ref3 = jax.block_until_ready(
        _dice_loss_ref(pred3.astype(jnp.float32), target3))
    assert np.allclose(np.asarray(loss3), np.asarray(ref3), rtol=1e-3, atol=1e-3), \
        (loss3, ref3)

    print("KERNEL_OK")
</pallas_src>

<mosaic_0001>
module attributes {stable_mosaic.version = 11 : i64} {
  func.func @_dice_stats_kernel(%arg0: i32, %arg1: i32, %arg2: i32, %arg3: memref<1x4x256xf32, #tpu.memory_space<vmem>>, %arg4: memref<1x1x256xi32, #tpu.memory_space<vmem>>, %arg5: memref<1x1x4x3xf32, #tpu.memory_space<vmem>>, %arg6: memref<4x128xf32, #tpu.memory_space<vmem>>, %arg7: memref<4x128xf32, #tpu.memory_space<vmem>>, %arg8: memref<4x128xf32, #tpu.memory_space<vmem>>) attributes {dimension_semantics = [#tpu.dimension_semantics<parallel>, #tpu.dimension_semantics<parallel>, #tpu.dimension_semantics<arbitrary>], iteration_bounds = array<i64: 2, 1, 1>, scalar_prefetch = 0 : i64, scratch_operands = 3 : i64, tpu.core_type = #tpu.core_type<tc>, window_params = [{transform_indices = @transform_0, window_bounds = array<i64: 1, 4, 256>}, {transform_indices = @transform_1, window_bounds = array<i64: 1, 1, 256>}, {transform_indices = @transform_2, window_bounds = array<i64: 1, 1, 4, 3>}]} {
    %c0_i32 = arith.constant 0 : i32
    %0 = arith.cmpi eq, %arg2, %c0_i32 : i32
    %1 = arith.extui %0 : i1 to i32
    %c0_i32_0 = arith.constant 0 : i32
    %2 = arith.cmpi ne, %1, %c0_i32_0 : i32
    scf.if %2 {
      %cst_24 = arith.constant 0.000000e+00 : f32
      %58 = vector.broadcast %cst_24 : f32 to vector<4x128xf32>
      %c0_25 = arith.constant 0 : index
      %c0_26 = arith.constant 0 : index
      %59 = vector.load %arg6[%c0_25, %c0_26] : memref<4x128xf32, #tpu.memory_space<vmem>>, vector<4x128xf32>
      tpu.vector_store %arg6[%c0_25, %c0_26], %58 {strides = array<i32>} : memref<4x128xf32, #tpu.memory_space<vmem>>, vector<4x128xf32>,
      %cst_27 = arith.constant 0.000000e+00 : f32
      %60 = vector.broadcast %cst_27 : f32 to vector<4x128xf32>
      %c0_28 = arith.constant 0 : index
      %c0_29 = arith.constant 0 : index
      %61 = vector.load %arg7[%c0_28, %c0_29] : memref<4x128xf32, #tpu.memory_space<vmem>>, vector<4x128xf32>
      tpu.vector_store %arg7[%c0_28, %c0_29], %60 {strides = array<i32>} : memref<4x128xf32, #tpu.memory_space<vmem>>, vector<4x128xf32>,
      %cst_30 = arith.constant 0.000000e+00 : f32
      %62 = vector.broadcast %cst_30 : f32 to vector<4x128xf32>
      %c0_31 = arith.constant 0 : index
      %c0_32 = arith.constant 0 : index
      %63 = vector.load %arg8[%c0_31, %c0_32] : memref<4x128xf32, #tpu.memory_space<vmem>>, vector<4x128xf32>
      tpu.vector_store %arg8[%c0_31, %c0_32], %62 {strides = array<i32>} : memref<4x128xf32, #tpu.memory_space<vmem>>, vector<4x128xf32>,
    } else {
    }
    %c0 = arith.constant 0 : index
    %c0_1 = arith.constant 0 : index
    %c0_2 = arith.constant 0 : index
    %3 = vector.load %arg3[%c0, %c0_1, %c0_2] : memref<1x4x256xf32, #tpu.memory_space<vmem>>, vector<1x4x256xf32>
    %4 = vector.shape_cast %3 : vector<1x4x256xf32> to vector<4x256xf32>
    %c0_3 = arith.constant 0 : index
    %c0_4 = arith.constant 0 : index
    %c0_5 = arith.constant 0 : index
    %5 = vector.load %arg4[%c0_3, %c0_4, %c0_5] : memref<1x1x256xi32, #tpu.memory_space<vmem>>, vector<1x1x256xi32>
    %6 = vector.shape_cast %5 : vector<1x1x256xi32> to vector<1x256xi32>
    %c-1_i32 = arith.constant -1 : i32
    %7 = vector.broadcast %c-1_i32 : i32 to vector<1x256xi32>
    %8 = arith.cmpi ne, %6, %7 : vector<1x256xi32>
    %9 = arith.extui %8 : vector<1x256xi1> to vector<1x256xi32>
    %10 = arith.sitofp %9 : vector<1x256xi32> to vector<1x256xf32>
    %cst = arith.constant dense<0xFF800000> : vector<256xf32>
    %11 = vector.multi_reduction <maximumf>, %4, %cst [0] : vector<4x256xf32> to vector<256xf32>
    %12 = vector.shape_cast %11 : vector<256xf32> to vector<1x256xf32>
    %13 = vector.broadcast %12 : vector<1x256xf32> to vector<4x256xf32>
    %14 = arith.subf %4, %13 : vector<4x256xf32>
    %15 = math.exp %14 : vector<4x256xf32>
    %cst_6 = arith.constant dense<0.000000e+00> : vector<256xf32>
    %16 = vector.multi_reduction <add>, %15, %cst_6 [0] : vector<4x256xf32> to vector<256xf32>
    %17 = vector.shape_cast %16 : vector<256xf32> to vector<1x256xf32>
    %18 = tpu.reciprocal %17 : vector<1x256xf32> -> vector<1x256xf32>
    %19 = vector.broadcast %18 : vector<1x256xf32> to vector<4x256xf32>
    %20 = arith.mulf %15, %19 : vector<4x256xf32>
    %21 = vector.broadcast %10 : vector<1x256xf32> to vector<4x256xf32>
    %22 = arith.mulf %20, %21 : vector<4x256xf32>
    %c0_i32_7 = arith.constant 0 : i32
    %c3_i32 = arith.constant 3 : i32
    %23 = vector.broadcast %c0_i32_7 : i32 to vector<1x256xi32>
    %24 = arith.maxsi %23, %6 : vector<1x256xi32>
    %25 = vector.broadcast %c3_i32 : i32 to vector<1x256xi32>
    %26 = arith.minsi %25, %24 : vector<1x256xi32>
    %27 = tpu.iota {dimensions = array<i32: 0>} : vector<4x256xi32>
    %28 = vector.broadcast %26 : vector<1x256xi32> to vector<4x256xi32>
    %29 = arith.cmpi eq, %27, %28 : vector<4x256xi32>
    %30 = arith.mulf %22, %20 : vector<4x256xf32>
    %c0_8 = arith.constant 0 : index
    %c0_9 = arith.constant 0 : index
    %31 = vector.load %arg6[%c0_8, %c0_9] : memref<4x128xf32, #tpu.memory_space<vmem>>, vector<4x128xf32>
    %cst_10 = arith.constant 0.000000e+00 : f32
    %32 = vector.broadcast %cst_10 : f32 to vector<4x256xf32>
    %33 = arith.select %29, %22, %32 : vector<4x256xi1>, vector<4x256xf32>
    %34 = vector.extract_strided_slice %33 {offsets = [0, 0], sizes = [4, 128], strides = [1, 1]} : vector<4x256xf32> to vector<4x128xf32>
    %35 = vector.extract_strided_slice %33 {offsets = [0, 128], sizes = [4, 128], strides = [1, 1]} : vector<4x256xf32> to vector<4x128xf32>
    %36 = arith.addf %34, %35 : vector<4x128xf32>
    %37 = arith.addf %31, %36 : vector<4x128xf32>
    %c0_11 = arith.constant 0 : index
    %c0_12 = arith.constant 0 : index
    %38 = vector.load %arg6[%c0_11, %c0_12] : memref<4x128xf32, #tpu.memory_space<vmem>>, vector<4x128xf32>
    tpu.vector_store %arg6[%c0_11, %c0_12], %37 {strides = array<i32>} : memref<4x128xf32, #tpu.memory_space<vmem>>, vector<4x128xf32>,
    %c0_13 = arith.constant 0 : index
    %c0_14 = arith.constant 0 : index
    %39 = vector.load %arg7[%c0_13, %c0_14] : memref<4x128xf32, #tpu.memory_space<vmem>>, vector<4x128xf32>
    %40 = vector.extract_strided_slice %30 {offsets = [0, 0], sizes = [4, 128], strides = [1, 1]} : vector<4x256xf32> to vector<4x128xf32>
    %41 = vector.extract_strided_slice %30 {offsets = [0, 128], sizes = [4, 128], strides = [1, 1]} : vector<4x256xf32> to vector<4x128xf32>
    %42 = arith.addf %40, %41 : vector<4x128xf32>
    %43 = arith.addf %39, %42 : vector<4x128xf32>
    %c0_15 = arith.constant 0 : index
    %c0_16 = arith.constant 0 : index
    %44 = vector.load %arg7[%c0_15, %c0_16] : memref<4x128xf32, #tpu.memory_space<vmem>>, vector<4x128xf32>
    tpu.vector_store %arg7[%c0_15, %c0_16], %43 {strides = array<i32>} : memref<4x128xf32, #tpu.memory_space<vmem>>, vector<4x128xf32>,
    %c0_17 = arith.constant 0 : index
    %c0_18 = arith.constant 0 : index
    %45 = vector.load %arg8[%c0_17, %c0_18] : memref<4x128xf32, #tpu.memory_space<vmem>>, vector<4x128xf32>
    %cst_19 = arith.constant 0.000000e+00 : f32
    %46 = vector.shape_cast %10 : vector<1x256xf32> to vector<1x256xf32>
    %47 = vector.broadcast %46 : vector<1x256xf32> to vector<4x256xf32>
    %48 = vector.broadcast %cst_19 : f32 to vector<4x256xf32>
    %49 = arith.select %29, %47, %48 : vector<4x256xi1>, vector<4x256xf32>
    %50 = vector.extract_strided_slice %49 {offsets = [0, 0], sizes = [4, 128], strides = [1, 1]} : vector<4x256xf32> to vector<4x128xf32>
    %51 = vector.extract_strided_slice %49 {offsets = [0, 128], sizes = [4, 128], strides = [1, 1]} : vector<4x256xf32> to vector<4x128xf32>
    %52 = arith.addf %50, %51 : vector<4x128xf32>
    %53 = arith.addf %45, %52 : vector<4x128xf32>
    %c0_20 = arith.constant 0 : index
    %c0_21 = arith.constant 0 : index
    %54 = vector.load %arg8[%c0_20, %c0_21] : memref<4x128xf32, #tpu.memory_space<vmem>>, vector<4x128xf32>
    tpu.vector_store %arg8[%c0_20, %c0_21], %53 {strides = array<i32>} : memref<4x128xf32, #tpu.memory_space<vmem>>, vector<4x128xf32>,
    %c0_i32_22 = arith.constant 0 : i32
    %55 = arith.cmpi eq, %arg2, %c0_i32_22 : i32
    %56 = arith.extui %55 : i1 to i32
    %c0_i32_23 = arith.constant 0 : i32
    %57 = arith.cmpi ne, %56, %c0_i32_23 : i32
    scf.if %57 {
      %c0_24 = arith.constant 0 : index
      %c0_25 = arith.constant 0 : index
      %58 = vector.load %arg6[%c0_24, %c0_25] : memref<4x128xf32, #tpu.memory_space<vmem>>, vector<4x128xf32>
      %cst_26 = arith.constant dense<0.000000e+00> : vector<4xf32>
      %59 = vector.multi_reduction <add>, %58, %cst_26 [1] : vector<4x128xf32> to vector<4xf32>
      %60 = vector.shape_cast %59 : vector<4xf32> to vector<4x1xf32>
      %c0_27 = arith.constant 0 : index
      %c0_28 = arith.constant 0 : index
      %61 = vector.load %arg7[%c0_27, %c0_28] : memref<4x128xf32, #tpu.memory_space<vmem>>, vector<4x128xf32>
      %cst_29 = arith.constant dense<0.000000e+00> : vector<4xf32>
      %62 = vector.multi_reduction <add>, %61, %cst_29 [1] : vector<4x128xf32> to vector<4xf32>
      %63 = vector.shape_cast %62 : vector<4xf32> to vector<4x1xf32>
      %c0_30 = arith.constant 0 : index
      %c0_31 = arith.constant 0 : index
      %64 = vector.load %arg8[%c0_30, %c0_31] : memref<4x128xf32, #tpu.memory_space<vmem>>, vector<4x128xf32>
      %cst_32 = arith.constant dense<0.000000e+00> : vector<4xf32>
      %65 = vector.multi_reduction <add>, %64, %cst_32 [1] : vector<4x128xf32> to vector<4xf32>
      %66 = vector.shape_cast %65 : vector<4xf32> to vector<4x1xf32>
      %67 = tpu.concatenate %60, %63, %66 in 1 : vector<4x1xf32>, vector<4x1xf32>, vector<4x1xf32> -> vector<4x3xf32>
      %c0_33 = arith.constant 0 : index
      %c0_34 = arith.constant 0 : index
      %c0_35 = arith.constant 0 : index
      %c0_36 = arith.constant 0 : index
      %68 = vector.load %arg5[%c0_33, %c0_34, %c0_35, %c0_36] : memref<1x1x4x3xf32, #tpu.memory_space<vmem>>, vector<1x1x4x3xf32>
      %69 = vector.shape_cast %68 : vector<1x1x4x3xf32> to vector<4x3xf32>
      %70 = vector.shape_cast %67 : vector<4x3xf32> to vector<1x1x4x3xf32>
      tpu.vector_store %arg5[%c0_33, %c0_34, %c0_35, %c0_36], %70 {strides = array<i32>} : memref<1x1x4x3xf32, #tpu.memory_space<vmem>>, vector<1x1x4x3xf32>,
    } else {
    }
    return
  }
  func.func @transform_0(%arg0: i32, %arg1: i32, %arg2: i32) -> (i32, i32, i32) {
    %c1_i32 = arith.constant 1 : i32
    %0 = arith.muli %arg1, %c1_i32 : i32
    %1 = arith.addi %0, %arg2 : i32
    %c0_i32 = arith.constant 0 : i32
    %c0_i32_0 = arith.constant 0 : i32
    return %arg0, %c0_i32, %1 : i32, i32, i32
  }
  func.func @transform_1(%arg0: i32, %arg1: i32, %arg2: i32) -> (i32, i32, i32) {
    %c1_i32 = arith.constant 1 : i32
    %0 = arith.muli %arg1, %c1_i32 : i32
    %1 = arith.addi %0, %arg2 : i32
    %c0_i32 = arith.constant 0 : i32
    %c0_i32_0 = arith.constant 0 : i32
    return %arg0, %c0_i32, %1 : i32, i32, i32
  }
  func.func @transform_2(%arg0: i32, %arg1: i32, %arg2: i32) -> (i32, i32, i32, i32) {
    %c0_i32 = arith.constant 0 : i32
    %c0_i32_0 = arith.constant 0 : i32
    %c0_i32_1 = arith.constant 0 : i32
    return %arg0, %arg1, %c0_i32, %c0_i32_0 : i32, i32, i32, i32
  }
}

</mosaic_0001>

<bundles_post_ra>
// kernel: tpu_custom_call.1
= control target key start
LH: loop header
LB: loop body
LE: loop exit
PB: predicated region body
PF: predicated region fallthrough
CT: control target
= control target key end

     0   :  { %7 = vsyncpa [#allocation6], 0  ;;  %s903_s0 = inlined_call_operand.hbm [shape: f32[2,4,256], index: 0, kind: input, shape index: {}]   ;;  %s904_s1 = inlined_call_operand.hbm [shape: s32[2,1,256], index: 1, kind: input, shape index: {}]   ;;  %s905_s2 = inlined_call_operand.vmem [shape: f32[2,1,4,3], index: 2, kind: output, shape index: {}]  }
   0x1   :  { %9 = vsyncpa [#allocation6 + $0x1], 0 }
   0x2   :  { %10 = vsyncpa [#allocation8], 0 }
   0x3   :  { %12 = vsyncpa [#allocation8 + $0x1], 0  ;;  %s716_s9 = smov 0   ;;  %s718_s10 = smov 0  }
   0x4   :  { %s720_s11 = smov 0   ;;  %s722_s12 = smov 0  }
   0x5   :  { %s724_s13 = smov 0   ;;  %s726_s14 = smov 0  }
   0x6 LB: > { %s495_s15 = sadd.s32 4294967295, %s696_s14   ;;  %s37_s16 = sadd.s32 1, %s692_s13  ;;  %s696_s14 = sphi %s726_s14, %s18_s14   ;;  %s692_s13 = sphi %s724_s13, %s919_s13   ;;  %s688_s12 = sphi %s722_s12, %s918_s12   ;;  %s684_s11 = sphi %s720_s11, %s917_s11   ;;  %s680_s10 = sphi %s718_s10, %s916_s10   ;;  %s676_s9 = sphi %s716_s9, %s915_s9  }
   0x7   : > { %p39_p0 = scmp.ge.s32.totalorder %s37_s16, 2  ;;  %s48_s17 = sadd.s32 1, %s684_s11 }
   0x8   : > { %p55_p1 = scmp.ne.s32.totalorder %s684_s11, %s680_s10  ;;  %p56_p2 = scmp.eq.s32.totalorder %s696_s14, 0 }
   0x9   : > { %s921_s16 = smov (%p39_p0, %s37_s16), 0  ;;  %p61_p4 = scmp.ne.s32.totalorder %s680_s10, %s676_s9 }
   0xa   : > { %p752_p3 = por %p56_p2, %p55_p1  ;;  %s43_s19 = ssub.s32 %s692_s13, %s921_s16 }
   0xb   : > { %p62_p5 = scmp.eq.s32.totalorder %s495_s15, 0  ;;  %p46_p6 = scmp.eq.s32.totalorder %s43_s19, 0 }
   0xc   : > { %p525_p8 = scmp.lt.s32.totalorder %s696_s14, 2  ;;  %s768_s22 = sand.u32 1, %s684_s11  }
   0xd   : > { %p759_p7 = por %p62_p5, %p61_p4  ;;  %s512_s23 = sshll.u32 %s692_s13, 7 }
   0xe   : > { %s765_s21 = scalar_select %p46_p6, %s684_s11, %s48_s17  }
   0xf   : > { %s908_s20 = scalar_select %p759_p7, 1, 0 }
  0x10   : > { %s499_s24 = sshll.u32 %s768_s22, 3  ;;  %s775_s27 = scalar_lea.hbm %s903_s0, %s512_s23 }
  0x11   : > { %s147_s28 = scalar_lea.vmem [#allocation5], %s499_s24  ;;  %p779_p9 = pnand %p525_p8, %p752_p3 }
  0x12   : > { %s158_s29 = sshll.u32 %s147_s28, 4  ;;  %s144_s3 = scalar_lea.sflag [#allocation6], %s768_s22  ;;  %s783_s29 = int_to_ptr.vmem [resolvable:$true] %s158_s29 }
  0x13   : > { %s582_s4 = scalar_lea.hbm %s775_s27, 128  ;;  %p584_p13 = pneg %p779_p9 }
  0x14   : > { %p583_p12 = scmp.ne.s32.totalorder %s775_s27, %s582_s4  ;;  %s587_s7 = scalar_lea.hbm %s903_s0, 256 }
  0x15   : > { %p588_p2 = scmp.lt.u32.totalorder %s775_s27, %s903_s0  ;;  %p589_p3 = scmp.lt.u32.totalorder %s587_s7, %s582_s4 }
  0x16   : > { %p585_p0 = pnand %p584_p13, %p583_p12  ;;  %p591_p5 = scmp.lt.u32.totalorder %s582_s4, %s775_s27 }
  0x17   : > { %p590_p4 = por %p589_p3, %p588_p2 }
  0x18   : > { %p586_p1 = pneg %p585_p0 }
  0x19   : > { %p592_p6 = por %p591_p5, %p590_p4 }
  0x1b   : > { %p593_p8 = pnand %p592_p6, %p586_p1 }
  0x1d   : > { %596 = shalt.err (!%p593_p8)
}
  0x1e   : > { %s597_s15 = scalar_lea.vmem %s783_s29, 128  ;;  %s698_s17 = smov [#allocation5]  }
  0x1f   : > { %p598_p12 = scmp.ne.s32.totalorder %s783_s29, %s597_s15  ;;  %s602_s18 = sshll.u32 %s698_s17, 4  ;;  %s603_s18 = int_to_ptr.vmem [resolvable:$false] %s602_s18 }
  0x20   : > { %s604_s19 = scalar_lea.vmem %s603_s18, 256  ;;  %p605_p11 = scmp.lt.s32.totalorder %s783_s29, %s603_s18 }
  0x21   : > { %p600_p0 = pnand %p598_p12, %p584_p13  ;;  %p606_p2 = scmp.lt.s32.totalorder %s604_s19, %s597_s15 }
  0x23   : > { %p601_p10 = pneg %p600_p0  ;;  %p607_p3 = por %p606_p2, %p605_p11 }
  0x25   : > { %p608_p4 = pnand %p607_p3, %p601_p10 }
  0x27   : > { %611 = shalt.err (!%p608_p4)
}
  0x28   : > { %521 = dma.hbm_to_vmem [thread:$0]  (!%p779_p9), %s775_s27, 128, %s783_s29, %s144_s3  }
  0x29   : > { %p910_p1 = scmp.lt.s32.totalorder %s696_s14, 3  ;;  %p911_p5 = scmp.ge.s32.totalorder %s696_s14, 1 }
  0x2a   : > { %s502_s24 = sshll.u32 %s768_s22, 1  ;;  %s513_s25 = sshll.u32 %s692_s13, 5 }
  0x2b   : > { %p817_p6 = pnand %p911_p5, %p910_p1  ;;  %s826_s4 = scalar_lea.hbm %s904_s1, %s513_s25 }
  0x2c   : > { %s169_s5 = scalar_lea.vmem [#allocation7], %s502_s24  ;;  %s166_s27 = scalar_lea.sflag [#allocation8], %s768_s22 }
  0x2d   : > { %s912_s23 = scalar_select %p817_p6, 1, 0 }
  0x2e   : > { %s180_s6 = sshll.u32 %s169_s5, 4  ;;  %s612_s29 = scalar_lea.hbm %s826_s4, 32  ;;  %s181_s6 = int_to_ptr.vmem [resolvable:$true] %s180_s6 }
  0x2f   : > { %p613_p10 = scmp.ne.s32.totalorder %s826_s4, %s612_s29  ;;  %s617_s8 = scalar_lea.hbm %s904_s1, 64 }
  0x30   : > { %p618_p12 = scmp.lt.u32.totalorder %s826_s4, %s904_s1  ;;  %p619_p0 = scmp.lt.u32.totalorder %s617_s8, %s612_s29 }
  0x31   : > { %p615_p11 = pnand %p613_p10, %p584_p13  ;;  %p621_p3 = scmp.lt.u32.totalorder %s612_s29, %s826_s4 }
  0x32   : > { %p620_p2 = por %p619_p0, %p618_p12 }
  0x33   : > { %p616_p8 = pneg %p615_p11 }
  0x34   : > { %p622_p4 = por %p621_p3, %p620_p2 }
  0x36   : > { %p623_p1 = pnand %p622_p4, %p616_p8 }
  0x38   : > { %626 = shalt.err (!%p623_p1)
}
  0x39   : > { %s627_s22 = scalar_lea.vmem %s181_s6, 32  ;;  %s699_s17 = smov [#allocation7]  }
  0x3a   : > { %p628_p5 = scmp.ne.s32.totalorder %s181_s6, %s627_s22  ;;  %s632_s18 = sshll.u32 %s699_s17, 4  ;;  %s633_s18 = int_to_ptr.vmem [resolvable:$false] %s632_s18 }
  0x3b   : > { %s634_s19 = scalar_lea.vmem %s633_s18, 64  ;;  %p635_p7 = scmp.lt.s32.totalorder %s181_s6, %s633_s18 }
  0x3c   : > { %p630_p10 = pnand %p628_p5, %p584_p13  ;;  %p636_p6 = scmp.lt.s32.totalorder %s634_s19, %s627_s22 }
  0x3e   : > { %p631_p11 = pneg %p630_p10  ;;  %p637_p0 = por %p636_p6, %p635_p7 }
  0x40   : > { %p638_p12 = pnand %p637_p0, %p631_p11 }
  0x42   : > { %641 = shalt.err (!%p638_p12)
}
  0x43   : > { %524 = dma.hbm_to_vmem [thread:$0]  (!%p779_p9), %s826_s4, 32, %s181_s6, %s166_s27  }
  0x44   : > { %p913_p8 = scmp.ne.s32.totalorder %s912_s23, 0 }
  0x45   : > { %s191_s24 = sand.u32 (!%p913_p8), 1, %s680_s10   ;;  %p914_p13 = scmp.ne.s32.totalorder (!%p913_p8), %s908_s20, 0 }
  0x46   : > { %189 = sbr.rel (%p913_p8) target bundleno = 312 (0x138), region = 28  ;;  %s506_s25 = sshll.u32 (!%p913_p8), %s191_s24, 3 }
  0x47   : > { %s192_s26 = scalar_lea.sflag (!%p913_p8), [#allocation6], %s191_s24  ;;  %s195_s28 = scalar_lea.vmem (!%p913_p8), [#allocation5], %s506_s25 }
  0x4d   : > { %667 = dma.done.wait (%p914_p13), %s192_s26, 128  }
  0x4e   : > { %669 = vsyncadd (%p914_p13), %s192_s26, 4294967168  ;;  %s507_s5 = sshll.u32 %s191_s24, 1  ;;  %s201_s29 = scalar_lea.sflag [#allocation8], %s191_s24 }
  0x4f   : > { %s204_s30 = scalar_lea.vmem [#allocation7], %s507_s5 }
  0x50   : > { %671 = dma.done.wait (%p914_p13), %s201_s29, 32  }
  0x51   : > { %673 = vsyncadd (%p914_p13), %s201_s29, 4294967264  ;;  %v700_v0 = vmov 0.0   ;;  %v305_v1 = vlaneseq  ;;  %vm258_vm0 = vcmask 1043456   ;;  %v250_v3 = vld [vmem:[%s195_s28] sm:$0xff]  ;;  %v251_v4 = vld [vmem:[%s204_s30] sm:$0x3] }
  0x52   : > { %247 = vst [vmem:[#allocation2] sm:$0xf] %v700_v0  ;;  %248 = vst [vmem:[#allocation3] sm:$0xf] %v700_v0  ;;  %vm252_vm1 = vcmp.ne.s32.totalorder %v251_v4, 4294967295  ;;  %v256_v5 = vcombine.high %v250_v3, %v250_v3  ;;  %v259_v6 = vsel %vm258_vm0, %v250_v3, -inf }
  0x53   : > { %249 = vst [vmem:[#allocation4] sm:$0xf] %v700_v0  ;;  %v859_v2 = vshrl.u32 %v305_v1, 7  ;;  %vm318_vm2 = vcmp.gt.s32.totalorder %v251_v4, 0  ;;  %v260_v7 = vrot.slane %v259_v6, 4  ;;  %v509_v11 = vsel %vm252_vm1, 1.0, %v700_v0 }
  0x54   : > { %v319_v10 = vsel %vm318_vm2, %v251_v4, 0  ;;  %v266_v12 = vsel %vm258_vm0, %v256_v5, -inf  ;;  %p236_p7 = scmp.lt.s32.totalorder %s688_s12, 1  ;;  %vm372_vm6 = vcmask 7168   ;;  %vm374_vm7 = vcmask 15360  }
  0x55   : > { %v307_v8 = vsub.s32 0, %v859_v2  ;;  %v311_v9 = vsub.s32 1, %v859_v2  ;;  %vm320_vm3 = vcmp.lt.s32.totalorder %v319_v10, 3  ;;  %v261_v13 = vmax.f32 %v259_v6, %v260_v7 }
  0x56   : > { %v267_v14 = vrot.slane %v266_v12, 4  ;;  %v321_v15 = vsel %vm320_vm3, %v319_v10, 3  ;;  %s923_s12 = smov (!%p236_p7, %s688_s12), 1  ;;  %vm376_vm8 = vcmask 19456  }
  0x57   : > { %v327_v16 = vrot.slane %v321_v15, %v307_v8  ;;  %v331_v17 = vrot.slane %v321_v15, %v311_v9  ;;  %v262_v18 = vrot.slane %v261_v13, 2  ;;  %v308_v20 = vrot.slane %v509_v11, %v307_v8  ;;  %s508_s20 = sshll.u32 %s923_s12, 2 }
  0x58   : > { %v268_v19 = vmax.f32 %v266_v12, %v267_v14  ;;  %v312_v21 = vrot.slane %v509_v11, %v311_v9  ;;  %s242_s6 = scalar_lea.vmem %s905_s2, %s508_s20 }
  0x59   : > { %vm332_vm4 = vcmp.eq.s32.totalorder %v859_v2, %v327_v16  ;;  %vm333_vm5 = vcmp.eq.s32.totalorder %v859_v2, %v331_v17  ;;  %v263_v22 = vmax.f32 %v261_v13, %v262_v18  ;;  %v335_v0 = vld [vmem:[#allocation2] sm:$0xf]  ;;  %v344_v5 = vld [vmem:[#allocation3] sm:$0xf] }
  0x5a   : > { %v269_v23 = vrot.slane %v268_v19, 2  ;;  %v351_v24 = vld [vmem:[#allocation4] sm:$0xf]  ;;  %v352_v25 = vsel %vm332_vm4, %v308_v20, 0.0  ;;  %v353_v26 = vsel %vm333_vm5, %v312_v21, 0.0  ;;  %v315_v58 = vcombine.low %v308_v20, %v312_v21 }
  0x5b   : > { %v354_v27 = vadd.f32 %v353_v26, %v352_v25  ;;  %v264_v28 = vrot.slane %v263_v22, 1 }
  0x5c   : > { %v270_v29 = vmax.f32 %v268_v19, %v269_v23 }
  0x5d   : > { %v355_v30 = vadd.f32 %v354_v27, %v351_v24  ;;  %v265_v31 = vmax.f32 %v263_v22, %v264_v28 }
  0x5e   : > { %v271_v32 = vrot.slane %v270_v29, 1 }
  0x5f   : > { %356 = vst [vmem:[#allocation4] sm:$0xf] %v355_v30 }
  0x60   : > { %v272_v33 = vmax.f32 %v270_v29, %v271_v32 }
  0x62   : > { %v275_v34 = vcombine.low %v265_v31, %v272_v33 }
  0x64   : > { %v277_v35 = vsub.f32 %v250_v3, %v275_v34 }
  0x66   : > { %v278_v36 = vmul.f32 1.442695, %v277_v35  ;;  %v368_v37 = vld [vmem:[#allocation4] sm:$0xf] }
  0x67   : > { %v369_v38 = vsel %vm258_vm0, %v368_v37, 0.0 }
  0x68   : > { %576 = vpow2.f32 %v278_v36  ;;  %370 = vadd.xlane.f32.xlu1 %v369_v38 }
  0x72   : > { %v577_v39 = vpop.eup %576 }
  0x73   : > { %v281_v40 = vcombine.high %v577_v39, %v577_v39  ;;  %v283_v41 = vsel %vm258_vm0, %v577_v39, 0.0 }
  0x74   : > { %v284_v42 = vrot.slane %v283_v41, 4 }
  0x75   : > { %v290_v43 = vsel %vm258_vm0, %v281_v40, 0.0 }
  0x76   : > { %v285_v44 = vadd.f32 %v284_v42, %v283_v41  ;;  %v291_v45 = vrot.slane %v290_v43, 4 }
  0x78   : > { %v286_v46 = vrot.slane %v285_v44, 2  ;;  %v292_v47 = vadd.f32 %v291_v45, %v290_v43 }
  0x7a   : > { %v287_v48 = vadd.f32 %v286_v46, %v285_v44  ;;  %v293_v49 = vrot.slane %v292_v47, 2 }
  0x7c   : > { %v288_v50 = vrot.slane %v287_v48, 1  ;;  %v294_v51 = vadd.f32 %v293_v49, %v292_v47 }
  0x7e   : > { %v289_v52 = vadd.f32 %v288_v50, %v287_v48  ;;  %v295_v53 = vrot.slane %v294_v51, 1 }
  0x80   : > { %v296_v54 = vadd.f32 %v295_v53, %v294_v51  ;;  %578 = vrcp.f32 %v289_v52 }
  0x82   : > { %580 = vrcp.f32 %v296_v54 }
  0x8a   : > { %v579_v55 = vpop.eup %578 }
  0x8c   : > { %v581_v56 = vpop.eup %580 }
  0x8d   : > { %v301_v57 = vcombine.low %v579_v55, %v581_v56 }
  0x8f   : > { %v303_v59 = vmul.f32 %v577_v39, %v301_v57 }
  0x91   : > { %v317_v60 = vmul.f32 %v315_v58, %v303_v59 }
  0x93   : > { %v337_v61 = vcombine.high %v317_v60, %v317_v60  ;;  %v339_v62 = vsel %vm332_vm4, %v317_v60, 0.0  ;;  %v334_v63 = vmul.f32 %v317_v60, %v303_v59 }
  0x95   : > { %v340_v1 = vsel %vm333_vm5, %v337_v61, 0.0  ;;  %v346_v3 = vrot.slane %v334_v63, 4 }
  0x96   : > { %v341_v4 = vadd.f32 %v340_v1, %v339_v62 }
  0x97   : > { %v348_v6 = vadd.f32 %v346_v3, %v334_v63 }
  0x98   : > { %v342_v7 = vadd.f32 %v341_v4, %v335_v0 }
  0x99   : > { %v349_v8 = vadd.f32 %v348_v6, %v344_v5 }
  0x9a   : > { %343 = vst [vmem:[#allocation2] sm:$0xf] %v342_v7 }
  0x9b   : > { %350 = vst [vmem:[#allocation3] sm:$0xf] %v349_v8 }
  0xa1   : > { %v360_v9 = vld [vmem:[#allocation2] sm:$0xf] }
  0xa2   : > { %v361_v10 = vsel %vm258_vm0, %v360_v9, 0.0  ;;  %v364_v11 = vld [vmem:[#allocation3] sm:$0xf] }
  0xa3   : > { %362 = vadd.xlane.f32.xlu0 %v361_v10  ;;  %v365_v12 = vsel %vm258_vm0, %v364_v11, 0.0 }
  0xa7   : > { %366 = vadd.xlane.f32.xlu0 %v365_v12 }
  0xf5   : > { %v371_v13 = vpop.xlane.xlu1 %370 }
 0x130   : > { %v363_v2 = vpop.xlane.xlu0 %362 }
 0x134   : > { %v367_v14 = vpop.xlane.xlu0 %366 }
 0x135   : > { %v373_v15 = vsel %vm372_vm6, %v363_v2, %v367_v14 }
 0x136   : > { %v375_v16 = vsel %vm374_vm7, %v373_v15, %v371_v13 }
 0x137   : > { %377 = vst.msk [vmem:[%s242_s6] sm:$0xf] %vm376_vm8, %v375_v16 }
 0x138 PF: > { %s18_s14 = sadd.s32 1, %s696_s14   ;;  %s915_s9 = smov %s680_s10 }
 0x139   : > { %p15_p9 = scmp.ge.s32.totalorder %s18_s14, 4   ;;  %s916_s10 = smov %s684_s11 }
 0x13a   : > { %s917_s11 = smov %s765_s21  ;;  %s918_s12 = smov %s692_s13 }
 0x13b   : > { %s919_s13 = smov %s921_s16  ;;  %17 = sbr.rel (!%p15_p9) target bundleno = 6 (0x6), region = 89 }
 0x142   :  { %403 = vsyncpa [#allocation6], 1 }
 0x143   :  { %405 = vsyncpa [#allocation6 + $0x1], 1 }
 0x144   :  { %406 = vsyncpa [#allocation8], 1 }
 0x145   :  { %408 = vsyncpa [#allocation8 + $0x1], 1 }

</bundles_post_ra>
